<compile_context>
chip_gen: v7x
topology: tpu7x:2x2x1
jax: 0.10.0
libtpu: 0.0.40
codegen_flags: <defaults>
</compile_context>

<pallas_src>
import functools

import jax
import jax.numpy as jnp
from jax.experimental import pallas as pl
from jax.experimental.pallas import tpu as pltpu


def _round_up(n, m):
    return ((n + m - 1) // m) * m


# ---------------------------------------------------------------------------
# Kernels
# ---------------------------------------------------------------------------
def _mlp_kernel_resident(x_ref, w1_ref, b1_ref, w2_ref, b2_ref, o_ref):
    """Whole hidden dim resident: Linear -> ReLU -> Linear -> ReLU in one shot."""
    h = jnp.dot(x_ref[...], w1_ref[...], preferred_element_type=jnp.float32)
    h = jnp.maximum(h + b1_ref[...].astype(jnp.float32), 0.0)
    # Feed the MXU in the weight dtype (bf16 models keep full throughput).
    h = h.astype(w2_ref.dtype)
    y = jnp.dot(h, w2_ref[...], preferred_element_type=jnp.float32)
    y = jnp.maximum(y + b2_ref[...].astype(jnp.float32), 0.0)
    o_ref[...] = y.astype(o_ref.dtype)


def _mlp_kernel_chunked(x_ref, w1_ref, b1_ref, w2_ref, b2_ref, o_ref, acc_ref):
    """Hidden dim D1 streamed in chunks along grid axis 1 (layer-2 K reduction)."""
    k = pl.program_id(1)

    @pl.when(k == 0)
    def _():
        acc_ref[...] = jnp.zeros_like(acc_ref)

    h = jnp.dot(x_ref[...], w1_ref[...], preferred_element_type=jnp.float32)
    h = jnp.maximum(h + b1_ref[...].astype(jnp.float32), 0.0)
    h = h.astype(w2_ref.dtype)
    acc_ref[...] += jnp.dot(h, w2_ref[...], preferred_element_type=jnp.float32)

    @pl.when(k == pl.num_programs(1) - 1)
    def _():
        y = jnp.maximum(acc_ref[...] + b2_ref[...].astype(jnp.float32), 0.0)
        o_ref[...] = y.astype(o_ref.dtype)


# ---------------------------------------------------------------------------
# Device / tiling heuristics
# ---------------------------------------------------------------------------
@functools.lru_cache(maxsize=None)
def _supports_single_buffer():
    if not hasattr(pl, "Buffered"):
        return False
    try:
        pl.BlockSpec((8, 128), lambda i: (0, 0), pipeline_mode=pl.Buffered(1))
        return True
    except TypeError:
        return False


@functools.lru_cache(maxsize=None)
def _vmem_budget():
    """Generation-aware usable VMEM budget (bytes)."""
    cap = 128 << 20
    try:
        cap = int(pltpu.get_tpu_info().vmem_capacity_bytes)
    except Exception:
        pass
    if cap <= (64 << 20):
        # v7x-class: leave headroom for compiler scratch / MRB staging.
        return max(cap - (12 << 20), 32 << 20)
    # 128 MiB parts (v5e/v6e): allow large resident weights + big row tiles.
    return min(cap - (24 << 20), 112 << 20)


def _choose_row_tile(rows, sub, per_row_bytes, resident_bytes, budget):
    avail = max(budget - resident_bytes - (8 << 20), sub * per_row_bytes)
    rt = max(sub, (avail // per_row_bytes) // sub * sub)
    # Keep >=~4 row tiles so the pipeline overlaps and both v7x TCs get work.
    rt = min(rt, max(sub, _round_up(pl.cdiv(rows, 4), sub)))
    rt = min(rt, 2048, _round_up(rows, sub))
    return int(rt)


# ---------------------------------------------------------------------------
# One-time parameter preparation (hoisted out of the forward path)
# ---------------------------------------------------------------------------
def prepare_mlp_params(w1, b1, w2, b2):
    """Pad the hidden dim D1 with zeros to a lane/chunk friendly size, once.

    Zero-padded hidden units contribute ReLU(0 + 0) = 0 to layer 2, so the
    padding is mathematically inert.  Returns (padded params, d1_chunk).
    """
    d0, d1 = w1.shape
    d2 = w2.shape[1]
    w_it = jnp.dtype(w1.dtype).itemsize
    budget = _vmem_budget()

    # Note: d1p could be padded to 256 on 256-wide MXUs (v6e/v7x) when d1 is
    # large; 128 keeps small hidden dims cheap and is optimal on v5e.
    d1p = _round_up(d1, 128)
    resident_bytes = (d0 * d1p + d1p + d1p * d2 + d2) * w_it
    if resident_bytes <= int(0.4 * budget):
        d1c = d1p                                    # weights fully resident
    else:
        d1c = 1024                                   # stream D1 in chunks
        while d1c > 128 and 2 * (d0 + d2 + 1) * d1c * w_it > int(0.4 * budget):
            d1c //= 2
        d1p = _round_up(d1, d1c)

    w1p = jnp.pad(w1, ((0, 0), (0, d1p - d1)))
    b1p = jnp.pad(b1, (0, d1p - d1)).reshape(1, d1p)
    w2p = jnp.pad(w2, ((0, d1p - d1), (0, 0)))
    b2p = b2.reshape(1, d2)
    return (w1p, b1p, w2p, b2p), int(d1c)


# ---------------------------------------------------------------------------
# Forward
# ---------------------------------------------------------------------------
@functools.partial(jax.jit, static_argnames=("d1c",))
def _mlp_forward_impl(x2d, w1p, b1p, w2p, b2p, *, d1c):
    rows, d0 = x2d.shape
    d1p = w1p.shape[1]
    d2 = w2p.shape[1]
    assert d1p % d1c == 0, "params must come from prepare_mlp_params"

    x_it = jnp.dtype(x2d.dtype).itemsize
    w_it = jnp.dtype(w1p.dtype).itemsize
    out_it = x_it
    sub = max(8, 32 // x_it)                         # sublane granularity

    n_k = d1p // d1c
    resident = n_k == 1
    single_buf = resident and _supports_single_buffer()

    if single_buf:
        w_bytes = (d0 * d1c + d1c + d1c * d2 + d2) * w_it
    else:
        w_bytes = 2 * (d0 * d1c + d1c + d1c * d2 + d2) * w_it
    per_row = 2 * d0 * x_it + 2 * d2 * out_it + d2 * 4 + d1c * 4
    budget = _vmem_budget()
    rt = _choose_row_tile(rows, sub, per_row, w_bytes, budget)
    n_row = pl.cdiv(rows, rt)

    def w_spec(shape, index_map):
        if single_buf:
            return pl.BlockSpec(shape, index_map, pipeline_mode=pl.Buffered(1))
        return pl.BlockSpec(shape, index_map)

    if resident:
        grid = (n_row,)
        in_specs = [
            pl.BlockSpec((rt, d0), lambda i: (i, 0)),     # x row tile
            w_spec((d0, d1c), lambda i: (0, 0)),          # W1 (resident)
            w_spec((1, d1c), lambda i: (0, 0)),           # b1
            w_spec((d1c, d2), lambda i: (0, 0)),          # W2 (resident)
            w_spec((1, d2), lambda i: (0, 0)),            # b2
        ]
        out_spec = pl.BlockSpec((rt, d2), lambda i: (i, 0))
        kernel = _mlp_kernel_resident
        scratch = []
        dims = ("parallel",)
        weight_passes = 1
    else:
        grid = (n_row, n_k)
        in_specs = [
            pl.BlockSpec((rt, d0), lambda i, k: (i, 0)),  # x row tile (held over k)
            pl.BlockSpec((d0, d1c), lambda i, k: (0, k)), # W1 column chunk
            pl.BlockSpec((1, d1c), lambda i, k: (0, k)),  # b1 chunk
            pl.BlockSpec((d1c, d2), lambda i, k: (k, 0)), # W2 row chunk
            pl.BlockSpec((1, d2), lambda i, k: (0, 0)),   # b2
        ]
        out_spec = pl.BlockSpec((rt, d2), lambda i, k: (i, 0))
        kernel = _mlp_kernel_chunked
        scratch = [pltpu.VMEM((rt, d2), jnp.float32)]
        dims = ("parallel", "arbitrary")
        weight_passes = n_row

    vmem_needed = (w_bytes + 2 * rt * d0 * x_it + 2 * rt * d2 * out_it
                   + rt * d1c * 4 + (0 if resident else rt * d2 * 4))
    vmem_limit = int(max(min(budget, vmem_needed + (8 << 20)), 16 << 20))

    weight_bytes_total = (d0 * d1p + d1p + d1p * d2 + d2) * w_it
    cost = pl.CostEstimate(
        flops=2 * rows * d1p * (d0 + d2),
        transcendentals=0,
        bytes_accessed=rows * (d0 + d2) * x_it + weight_bytes_total * weight_passes,
    )

    return pl.pallas_call(
        kernel,
        out_shape=jax.ShapeDtypeStruct((rows, d2), x2d.dtype),
        grid_spec=pltpu.PrefetchScalarGridSpec(
            num_scalar_prefetch=0,
            grid=grid,
            in_specs=in_specs,
            out_specs=out_spec,
            scratch_shapes=scratch,
        ),
        compiler_params=pltpu.CompilerParams(
            dimension_semantics=dims,
            vmem_limit_bytes=vmem_limit,
        ),
        cost_estimate=cost,
    )(x2d, w1p, b1p, w2p, b2p)


def mlp_forward(x, prepared_params, d1_chunk):
    """MLPModule forward: x[..., D0] -> [..., D2].

    `prepared_params` / `d1_chunk` come from prepare_mlp_params() (one-time
    zero-padding of the hidden dim); weights are stored as (in, out), i.e. the
    torch.nn.Linear (out, in) weight transposed.
    """
    w1p, _, w2p, _ = prepared_params
    d0 = w1p.shape[0]
    d2 = w2p.shape[1]
    x2d = x.reshape(-1, d0)
    out2d = _mlp_forward_impl(x2d, *prepared_params, d1c=d1_chunk)
    return out2d.reshape(*x.shape[:-1], d2)


def init_mlp_params(key, mlp_layers, dtype=jnp.float32):
    """Deterministic init of Linear weights/biases (Kaiming-uniform-ish)."""
    params = []
    for d_in, d_out in zip(mlp_layers[:-1], mlp_layers[1:]):
        key, kw, kb = jax.random.split(key, 3)
        bound = 1.0 / (d_in ** 0.5)
        # Stored directly as (in, out) == torch weight (out, in) transposed.
        w = jax.random.uniform(kw, (d_in, d_out), dtype, -bound, bound)
        b = jax.random.uniform(kb, (d_out,), dtype, -bound, bound)
        params.append((w, b))
    return params


if __name__ == "__main__":
    # MLPModule([32, 64, 32], 'ReLU', dropout=0.0) applied to x of shape (2, 8, 32).
    mlp_layers = [32, 64, 32]
    key = jax.random.PRNGKey(0)
    key, kx = jax.random.split(key)
    x = jax.random.normal(kx, (2, 8, mlp_layers[0]), dtype=jnp.float32)

    (w1, b1), (w2, b2) = init_mlp_params(key, mlp_layers)
    params, d1_chunk = prepare_mlp_params(w1, b1, w2, b2)

    def ref_fn(xv):
        h = jnp.maximum(xv.reshape(-1, mlp_layers[0]) @ w1 + b1, 0.0)
        return jnp.maximum(h @ w2 + b2, 0.0).reshape(*xv.shape[:-1], mlp_layers[-1])

    out = jax.block_until_ready(mlp_forward(x, params, d1_chunk))
    assert out.shape == (2, 8, mlp_layers[-1])
    assert jnp.allclose(out, ref_fn(x), atol=1e-5, rtol=1e-5)

    # Ragged row count (rows not a multiple of the row tile) exercises the
    # masked last row tile — there is no host-side padding / slicing anymore.
    key, kx2 = jax.random.split(key)
    x2 = jax.random.normal(kx2, (3, 5, mlp_layers[0]), dtype=jnp.float32)
    out2 = jax.block_until_ready(mlp_forward(x2, params, d1_chunk))
    assert out2.shape == (3, 5, mlp_layers[-1])
    assert jnp.allclose(out2, ref_fn(x2), atol=1e-5, rtol=1e-5)

    # TODO(synk): with bf16 weights, layer-1 output is intentionally downcast to
    # bf16 before the second matmul (full MXU throughput); numerics then differ
    # slightly from a pure-f32 PyTorch reference.
    print("KERNEL_OK")
</pallas_src>

<mosaic_0001>
module attributes {stable_mosaic.version = 11 : i64} {
  func.func @_mlp_kernel_resident(%arg0: i32, %arg1: memref<8x32xf32, #tpu.memory_space<vmem>>, %arg2: memref<32x128xf32, #tpu.memory_space<vmem>>, %arg3: memref<1x128xf32, #tpu.memory_space<vmem>>, %arg4: memref<128x32xf32, #tpu.memory_space<vmem>>, %arg5: memref<1x32xf32, #tpu.memory_space<vmem>>, %arg6: memref<8x32xf32, #tpu.memory_space<vmem>>) attributes {dimension_semantics = [#tpu.dimension_semantics<parallel>], iteration_bounds = array<i64: 2>, scalar_prefetch = 0 : i64, scratch_operands = 0 : i64, tpu.core_type = #tpu.core_type<tc>, window_params = [{transform_indices = @transform_0, window_bounds = array<i64: 8, 32>}, {pipeline_mode = #tpu.pipeline_mode<synchronous>, transform_indices = @transform_1, window_bounds = array<i64: 32, 128>}, {pipeline_mode = #tpu.pipeline_mode<synchronous>, transform_indices = @transform_2, window_bounds = array<i64: 1, 128>}, {pipeline_mode = #tpu.pipeline_mode<synchronous>, transform_indices = @transform_3, window_bounds = array<i64: 128, 32>}, {pipeline_mode = #tpu.pipeline_mode<synchronous>, transform_indices = @transform_4, window_bounds = array<i64: 1, 32>}, {transform_indices = @transform_5, window_bounds = array<i64: 8, 32>}]} {
    %c0 = arith.constant 0 : index
    %c0_0 = arith.constant 0 : index
    %0 = vector.load %arg1[%c0, %c0_0] : memref<8x32xf32, #tpu.memory_space<vmem>>, vector<8x32xf32>
    %c0_1 = arith.constant 0 : index
    %c0_2 = arith.constant 0 : index
    %1 = vector.load %arg2[%c0_1, %c0_2] : memref<32x128xf32, #tpu.memory_space<vmem>>, vector<32x128xf32>
    %cst = arith.constant dense<0.000000e+00> : vector<8x128xf32>
    %2 = tpu.matmul %0, %1, %cst {dimension_numbers = #tpu.dot_dimension_numbers<[1], [0], [0], [1], [0, 0, 1, 1], [], []>} : vector<8x32xf32>, vector<32x128xf32>, vector<8x128xf32> -> vector<8x128xf32>
    %c0_3 = arith.constant 0 : index
    %c0_4 = arith.constant 0 : index
    %3 = vector.load %arg3[%c0_3, %c0_4] : memref<1x128xf32, #tpu.memory_space<vmem>>, vector<1x128xf32>
    %4 = vector.broadcast %3 : vector<1x128xf32> to vector<8x128xf32>
    %5 = arith.addf %2, %4 : vector<8x128xf32>
    %cst_5 = arith.constant 0.000000e+00 : f32
    %6 = vector.broadcast %cst_5 : f32 to vector<8x128xf32>
    %7 = arith.maximumf %5, %6 : vector<8x128xf32>
    %c0_6 = arith.constant 0 : index
    %c0_7 = arith.constant 0 : index
    %8 = vector.load %arg4[%c0_6, %c0_7] : memref<128x32xf32, #tpu.memory_space<vmem>>, vector<128x32xf32>
    %cst_8 = arith.constant dense<0.000000e+00> : vector<8x32xf32>
    %9 = tpu.matmul %7, %8, %cst_8 {dimension_numbers = #tpu.dot_dimension_numbers<[1], [0], [0], [1], [0, 0, 1, 1], [], []>} : vector<8x128xf32>, vector<128x32xf32>, vector<8x32xf32> -> vector<8x32xf32>
    %c0_9 = arith.constant 0 : index
    %c0_10 = arith.constant 0 : index
    %10 = vector.load %arg5[%c0_9, %c0_10] : memref<1x32xf32, #tpu.memory_space<vmem>>, vector<1x32xf32>
    %11 = vector.broadcast %10 : vector<1x32xf32> to vector<8x32xf32>
    %12 = arith.addf %9, %11 : vector<8x32xf32>
    %cst_11 = arith.constant 0.000000e+00 : f32
    %13 = vector.broadcast %cst_11 : f32 to vector<8x32xf32>
    %14 = arith.maximumf %12, %13 : vector<8x32xf32>
    %c0_12 = arith.constant 0 : index
    %c0_13 = arith.constant 0 : index
    %15 = vector.load %arg6[%c0_12, %c0_13] : memref<8x32xf32, #tpu.memory_space<vmem>>, vector<8x32xf32>
    tpu.vector_store %arg6[%c0_12, %c0_13], %14 {strides = array<i32>} : memref<8x32xf32, #tpu.memory_space<vmem>>, vector<8x32xf32>,
    return
  }
  func.func @transform_0(%arg0: i32) -> (i32, i32) {
    %c0_i32 = arith.constant 0 : i32
    %c0_i32_0 = arith.constant 0 : i32
    return %arg0, %c0_i32 : i32, i32
  }
  func.func @transform_1(%arg0: i32) -> (i32, i32) {
    %c0_i32 = arith.constant 0 : i32
    %c0_i32_0 = arith.constant 0 : i32
    %c0_i32_1 = arith.constant 0 : i32
    return %c0_i32, %c0_i32_0 : i32, i32
  }
  func.func @transform_2(%arg0: i32) -> (i32, i32) {
    %c0_i32 = arith.constant 0 : i32
    %c0_i32_0 = arith.constant 0 : i32
    %c0_i32_1 = arith.constant 0 : i32
    return %c0_i32, %c0_i32_0 : i32, i32
  }
  func.func @transform_3(%arg0: i32) -> (i32, i32) {
    %c0_i32 = arith.constant 0 : i32
    %c0_i32_0 = arith.constant 0 : i32
    %c0_i32_1 = arith.constant 0 : i32
    return %c0_i32, %c0_i32_0 : i32, i32
  }
  func.func @transform_4(%arg0: i32) -> (i32, i32) {
    %c0_i32 = arith.constant 0 : i32
    %c0_i32_0 = arith.constant 0 : i32
    %c0_i32_1 = arith.constant 0 : i32
    return %c0_i32, %c0_i32_0 : i32, i32
  }
  func.func @transform_5(%arg0: i32) -> (i32, i32) {
    %c0_i32 = arith.constant 0 : i32
    %c0_i32_0 = arith.constant 0 : i32
    return %arg0, %c0_i32 : i32, i32
  }
}

</mosaic_0001>

<bundles_post_ra>
// kernel: _mlp_forward_impl.1
= control target key start
LH: loop header
LB: loop body
LE: loop exit
PB: predicated region body
PF: predicated region fallthrough
CT: control target
= control target key end

     0   :  { %10 = vsyncpa [#allocation3], 0  ;;  %s894_s0 = inlined_call_operand.vmem [shape: f32[16,32], index: 0, kind: input, shape index: {}]   ;;  %s895_s1 = inlined_call_operand.vmem [shape: f32[32,128], index: 1, kind: input, shape index: {}]   ;;  %s896_s2 = inlined_call_operand.vmem [shape: f32[1,128], index: 2, kind: input, shape index: {}]   ;;  %s897_s3 = inlined_call_operand.vmem [shape: f32[128,32], index: 3, kind: input, shape index: {}]   ;;  %s898_s4 = inlined_call_operand.vmem [shape: f32[1,32], index: 4, kind: input, shape index: {}]   ;;  %s899_s5 = inlined_call_operand.hbm [shape: f32[16,32], index: 5, kind: output, shape index: {}]  }
   0x1   :  { %12 = vsyncpa [#allocation3 + $0x1], 0  ;;  %s726_s18 = smov 0   ;;  %s728_s19 = smov 0  }
   0x2   :  { %s730_s20 = smov 0   ;;  %s732_s21 = smov 0  }
   0x3 LB: > { %s747_s22 = sadd.s32 4294967295, %s690_s21   ;;  %s475_s23 = sadd.s32 4294967294, %s690_s21   ;;  %s690_s21 = sphi %s732_s21, %s905_s21   ;;  %s686_s20 = sphi %s730_s20, %s904_s20   ;;  %s682_s19 = sphi %s728_s19, %s903_s19   ;;  %s678_s18 = sphi %s726_s18, %s902_s18  }
   0x4   : > { %s751_s24 = sadd.s32 1, %s690_s21   ;;  %s135_s25 = sadd.s32 1, %s686_s20 }
   0x5   : > { %s132_s26 = ssub.s32 %s690_s21, %s751_s24  ;;  %p145_p0 = scmp.ne.s32.totalorder %s686_s20, %s682_s19 }
   0x6   : > { %p133_p1 = scmp.eq.s32.totalorder %s132_s26, 0  ;;  %p146_p2 = scmp.eq.s32.totalorder %s747_s22, 1 }
   0x7   : > { %p151_p3 = scmp.ne.s32.totalorder %s682_s19, %s678_s18  ;;  %p152_p4 = scmp.eq.s32.totalorder %s475_s23, 1 }
   0x8   : > { %s762_s27 = scalar_select %p133_p1, %s686_s20, %s135_s25  }
   0x9   : > { %p764_p5 = por %p146_p2, %p145_p0  ;;  %p768_p6 = por %p152_p4, %p151_p3 }
   0xa   : > { %p478_p7 = scmp.ge.s32.totalorder %s690_s21, 1  ;;  %p189_p8 = scmp.lt.s32.totalorder %s690_s21, 3 }
   0xc   : > { %p190_p9 = pnand %p478_p7, %p189_p8 }
   0xd   : > { %v221_v0 = vld [vmem:[%s895_s1] sm:$0xff] (!%p190_p9)  ;;  %v222_v1 = vld [vmem:[%s895_s1 + $0x8] sm:$0xff] (!%p190_p9)  ;;  %v223_v2 = vld [vmem:[%s895_s1 + $0x10] sm:$0xff] (!%p190_p9)  ;;  %v692_v3 = vmov (!%p190_p9), 0.0|0.0   ;;  %vm693_vm0 = vmmov (!%p190_p9), 0   ;;  %v694_v6 = vmov (!%p190_p9), 0.0  }
   0xe   : > { %193 = sbr.rel (%p190_p9) target bundleno = 472 (0x1d8), region = 40  ;;  %556 = vmatprep.subr.bf16.mxu0 (!%p190_p9), %v692_v3  ;;  %v557_v4 = vpack.c.bf16 (!%p190_p9), %v222_v1, %v221_v0  ;;  %v224_v5 = vld [vmem:[%s895_s1 + $0x18] sm:$0xff] (!%p190_p9)  ;;  %518 = vmatprep.mubr.msk.f32.mxu0 (!%p190_p9), %vm693_vm0, %v694_v6  ;;  %p216_p10 = scmp.lt.s32.totalorder (!%p190_p9), %s747_s22, 1  ;;  %v307_v7 = vld [vmem:[%s897_s3] sm:$0xff] (!%p190_p9)  ;;  %v308_v8 = vld [vmem:[%s897_s3 + $0x8] sm:$0xff] (!%p190_p9)  ;;  %vm232_vm1 = vcmask (!%p190_p9), 261120  }
   0xf   : > { %562 = vmatprep.subr.bf16.mxu1 (!%p190_p9), %v692_v3  ;;  %v563_v9 = vpack.c.bf16 (!%p190_p9), %v308_v8, %v307_v7  ;;  %v309_v10 = vld [vmem:[%s897_s3 + $0x10] sm:$0xff] (!%p190_p9)  ;;  %v310_v11 = vld [vmem:[%s897_s3 + $0x18] sm:$0xff] (!%p190_p9)  ;;  %553 = vmatprep.mubr.msk.f32.mxu1 (!%p190_p9), %vm693_vm0, %v694_v6  ;;  %v560_v12 = vpack.c.bf16 (!%p190_p9), %v224_v5, %v223_v2  ;;  %v311_v14 = vld [vmem:[%s897_s3 + $0x20] sm:$0xff] (!%p190_p9)  ;;  %s213_s26 = sand.u32 (!%p190_p9), 1, %s682_s19   ;;  %s485_s8 = sshll.u32 (!%p190_p9), %s747_s22, 7 }
  0x10   : > { %558 = vmatpush3.bf16.msra.mxu0 (!%p190_p9), %v557_v4  ;;  %v566_v13 = vpack.c.bf16 (!%p190_p9), %v310_v11, %v309_v10  ;;  %v312_v15 = vld [vmem:[%s897_s3 + $0x28] sm:$0xff] (!%p190_p9)  ;;  %v313_v18 = vld [vmem:[%s897_s3 + $0x30] sm:$0xff] (!%p190_p9)  ;;  %v314_v19 = vld [vmem:[%s897_s3 + $0x38] sm:$0xff] (!%p190_p9)  ;;  %s403_s14 = scalar_lea.sflag (!%p190_p9), [#allocation3], %s213_s26 }
  0x11   : > { %559 = vmatprep.subr.bf16.mxu0 (!%p190_p9), %v692_v3  ;;  %564 = vmatpush3.bf16.msra.mxu1 (!%p190_p9), %v563_v9  ;;  %v569_v17 = vpack.c.bf16 (!%p190_p9), %v312_v15, %v311_v14  ;;  %v572_v20 = vpack.c.bf16 (!%p190_p9), %v314_v19, %v313_v18  ;;  %v315_v21 = vld [vmem:[%s897_s3 + $0x40] sm:$0xff] (!%p190_p9)  ;;  %v316_v22 = vld [vmem:[%s897_s3 + $0x48] sm:$0xff] (!%p190_p9)  ;;  %v317_v24 = vld [vmem:[%s897_s3 + $0x50] sm:$0xff] (!%p190_p9) }
  0x12   : > { %565 = vmatprep.subr.bf16.mxu1 (!%p190_p9), %v692_v3  ;;  %v575_v23 = vpack.c.bf16 (!%p190_p9), %v316_v22, %v315_v21  ;;  %v318_v25 = vld [vmem:[%s897_s3 + $0x58] sm:$0xff] (!%p190_p9)  ;;  %v319_v27 = vld [vmem:[%s897_s3 + $0x60] sm:$0xff] (!%p190_p9)  ;;  %v320_v28 = vld [vmem:[%s897_s3 + $0x68] sm:$0xff] (!%p190_p9) }
  0x13   : > { %v578_v26 = vpack.c.bf16 (!%p190_p9), %v318_v25, %v317_v24  ;;  %v581_v29 = vpack.c.bf16 (!%p190_p9), %v320_v28, %v319_v27  ;;  %v321_v30 = vld [vmem:[%s897_s3 + $0x70] sm:$0xff] (!%p190_p9)  ;;  %v322_v31 = vld [vmem:[%s897_s3 + $0x78] sm:$0xff] (!%p190_p9)  ;;  %v481_v33 = vld [vmem:[%s896_s2] ss:$0 sm:$0xff] (!%p190_p9) }
  0x14   : > { %561 = vmatpush3.bf16.msra.mxu0 (!%p190_p9), %v560_v12  ;;  %v584_v32 = vpack.c.bf16 (!%p190_p9), %v322_v31, %v321_v30  ;;  %v483_v38 = vld [vmem:[%s898_s4] ss:$0 sm:$0xff] (!%p190_p9) }
  0x15   : > { %s217_s30 = scalar_select %p216_p10, %s747_s22, 1  ;;  %567 = vmatpush3.bf16.msra.mxu1 %v566_v13 }
  0x16   : > { %568 = vmatprep.subr.bf16.mxu1 %v692_v3  ;;  %s695_s22 = smov [#allocation2]  }
  0x17   : > { %s480_s6 = sshll.u32 %s217_s30, 3  ;;  %s479_s30 = sshll.u32 %s213_s26, 3 }
  0x18   : > { %s219_s13 = scalar_lea.vmem %s894_s0, %s480_s6  ;;  %s215_s9 = scalar_lea.vmem [#allocation2], %s479_s30 }
  0x19   : > { %v220_v16 = vld [vmem:[%s219_s13] sm:$0xff]  ;;  %570 = vmatpush3.bf16.msra.mxu1 %v569_v17  ;;  %s416_s10 = sshll.u32 %s215_s9, 4  ;;  %s851_s13 = scalar_lea.hbm %s899_s5, %s485_s8  ;;  %s853_s10 = int_to_ptr.vmem [resolvable:$true] %s416_s10 }
  0x1a   : > { %519 = vmatmul.mubr.msk.f32.vlgmr.msra.gmra.mrb[0].mxu0 %vm232_vm1, %v220_v16  ;;  %571 = vmatprep.subr.bf16.mxu1 %v692_v3  ;;  %s628_s15 = scalar_lea.vmem %s853_s10, 128  ;;  %s632_s16 = sshll.u32 %s695_s22, 4  ;;  %s633_s16 = int_to_ptr.vmem [resolvable:$false] %s632_s16 }
  0x1b   : > { %p629_p11 = scmp.ne.s32.totalorder %s853_s10, %s628_s15  ;;  %s634_s17 = scalar_lea.vmem %s633_s16, 256 }
  0x1c   : > { %p635_p0 = scmp.lt.s32.totalorder %s853_s10, %s633_s16  ;;  %p636_p1 = scmp.lt.s32.totalorder %s634_s17, %s628_s15 }
  0x1d   : > { %573 = vmatpush3.bf16.msra.mxu1 %v572_v20  ;;  %p630_p12 = pnand %p629_p11, %p764_p5 }
  0x1e   : > { %574 = vmatprep.subr.bf16.mxu1 %v692_v3  ;;  %p637_p2 = por %p636_p1, %p635_p0 }
  0x1f   : > { %p631_p13 = pneg %p630_p12 }
  0x21   : > { %576 = vmatpush3.bf16.msra.mxu1 %v575_v23  ;;  %p638_p3 = pnand %p637_p2, %p631_p13 }
  0x22   : > { %577 = vmatprep.subr.bf16.mxu1 %v692_v3 }
  0x25   : > { %579 = vmatpush3.bf16.msra.mxu1 %v578_v26 }
  0x26   : > { %580 = vmatprep.subr.bf16.mxu1 %v692_v3 }
  0x29   : > { %582 = vmatpush3.bf16.msra.mxu1 %v581_v29 }
  0x2a   : > { %583 = vmatprep.subr.bf16.mxu1 %v692_v3 }
  0x2d   : > { %585 = vmatpush3.bf16.msra.mxu1 %v584_v32 }
  0xed   : > { %v302_v34 = vpop.f32.mrb[0].mxu0 }
  0xee   : > { %v303_v35 = vadd.f32 %v481_v33, %v302_v34  ;;  %v520_v36 = vpop.f32.mrb[1].mxu0 }
  0xf0   : > { %v306_v37 = vmax.f32 %v303_v35, 0.0 }
  0xf2   : > { %554 = vmatmul.mubr.f32.vlgmr.msra.gmra.mrb[0].mxu1 %v306_v37 }
 0x1c5   : > { %v396_v39 = vpop.f32.mrb[0].mxu1 }
 0x1c6   : > { %v397_v40 = vadd.f32 %v483_v38, %v396_v39  ;;  %v555_v41 = vpop.f32.mrb[1].mxu1 }
 0x1c8   : > { %v400_v42 = vmax.f32 %v397_v40, 0.0 }
 0x1ca   : > { %401 = vst.msk [vmem:[%s215_s9] sm:$0xff] %vm232_vm1, %v400_v42 }
 0x1cb   : > { %641 = shalt.err (!%p638_p3)
}
 0x1cc   : > { %s642_s23 = scalar_lea.hbm %s851_s13, 128  ;;  %s646_s30 = scalar_lea.hbm %s899_s5, 256 }
 0x1cd   : > { %p643_p4 = scmp.ne.s32.totalorder %s851_s13, %s642_s23  ;;  %p647_p9 = scmp.lt.u32.totalorder %s851_s13, %s899_s5 }
 0x1ce   : > { %p648_p10 = scmp.lt.u32.totalorder %s646_s30, %s642_s23  ;;  %p650_p12 = scmp.lt.u32.totalorder %s642_s23, %s851_s13 }
 0x1cf   : > { %p644_p7 = pnand %p643_p4, %p764_p5 }
 0x1d0   : > { %p649_p11 = por %p648_p10, %p647_p9 }
 0x1d1   : > { %p645_p8 = pneg %p644_p7 }
 0x1d2   : > { %p651_p13 = por %p650_p12, %p649_p11 }
 0x1d4   : > { %p652_p0 = pnand %p651_p13, %p645_p8 }
 0x1d6   : > { %655 = shalt.err (!%p652_p0)
}
 0x1d7   : > { %586 = dma.vmem_to_hbm [thread:$0]  (%p764_p5), %s853_s10, 128, %s851_s13, %s403_s14  }
 0x1d8 PF: > { %p592_p1 = scmp.ge.s32.totalorder %s690_s21, 2  ;;  %s428_s8 = sand.u32 1, %s678_s18  }
 0x1d9   : > { %s429_s9 = scalar_lea.sflag [#allocation3], %s428_s8 }
 0x1da   : > { %p589_p2 = pnand %p592_p1, %p768_p6 }
 0x1dc   : > { %673 = dma.done.wait (!%p589_p2), %s429_s9, 128  }
 0x1dd   : > { %675 = vsyncadd (!%p589_p2), %s429_s9, 4294967168  ;;  %p15_p3 = scmp.ge.s32.totalorder %s751_s24, 4   ;;  %s902_s18 = smov %s682_s19 }
 0x1de   : > { %s903_s19 = smov %s686_s20  ;;  %s904_s20 = smov %s762_s27 }
 0x1df   : > { %s905_s21 = smov %s751_s24  ;;  %17 = sbr.rel (!%p15_p3) target bundleno = 3 (0x3), region = 75 }
 0x1e6   :  { %434 = vsyncpa [#allocation3], 1 }
 0x1e7   :  { %436 = vsyncpa [#allocation3 + $0x1], 1 }

</bundles_post_ra>
